<compile_context>
chip_gen: v7x
topology: tpu7x:2x2x1
jax: 0.10.0
libtpu: 0.0.40
codegen_flags: <defaults>
</compile_context>

<pallas_src>
import jax
import jax.numpy as jnp
import numpy as np
from jax.experimental import pallas as pl
from jax.experimental.pallas import tpu as pltpu


# ---------------------------------------------------------------------------
# Pallas kernels
# ---------------------------------------------------------------------------

def _conv3x3_s2_kernel(xm_ref, xh_ref, wa_ref, wb_ref, b_ref, o_ref):
    """3x3 / stride-2 / pad-1 conv on a lane-folded, row-parity-split view.

    xm_ref: (1, th, 2, Wo+1, 2C)  main rows  q = t*th .. t*th+th-1
    xh_ref: (1, 1,  2, Wo+1, 2C)  halo row   q = (t+1)*th
    wa_ref: (3, 2C, tn)           taps (ky, kx in {0,1}) stacked along K
    wb_ref: (3, Kb, tn)           taps (ky, kx=2); Kb = C, or 2C zero-padded
    b_ref:  (1, tn)
    o_ref:  (1, th, Wo, tn)
    """
    th, Wo, tn = o_ref.shape[1], o_ref.shape[2], o_ref.shape[3]
    c2 = xm_ref.shape[4]
    kb = wb_ref.shape[1]
    m = th * Wo

    xm = xm_ref[0]                                  # (th, 2, Wo+1, 2C)
    xh = xh_ref[0]                                  # (1,  2, Wo+1, 2C)
    r0 = xm[:, 0]                                   # padded rows 2*ho
    r1 = xm[:, 1]                                   # padded rows 2*ho + 1
    if th > 1:                                      # padded rows 2*ho + 2
        r2 = jnp.concatenate([r0[1:], xh[:, 0]], axis=0)
    else:
        r2 = xh[:, 0]

    # Accumulator starts at the bias (saves a separate VPU add pass).
    acc = jnp.broadcast_to(b_ref[...].astype(jnp.float32), (m, tn))
    for ky, rows in enumerate((r0, r1, r2)):
        # Column taps kx=0,1: full 2C lanes, one K=2C matmul.
        lhs_a = rows[:, :Wo, :].reshape(m, c2)
        acc = acc + jnp.dot(lhs_a, wa_ref[ky],
                            preferred_element_type=jnp.float32)
        # Column tap kx=2: shift wq by one; K = kb (2C if zero-padded).
        lhs_b = rows[:, 1:, :kb].reshape(m, kb)
        acc = acc + jnp.dot(lhs_b, wb_ref[ky],
                            preferred_element_type=jnp.float32)
    o_ref[...] = acc.reshape(1, th, Wo, tn).astype(o_ref.dtype)


def _avgpool2x2_kernel(x_ref, o_ref):
    """AvgPool2d(2, 2) on a lane-folded tile.

    x_ref: (1, th, 2, Wo, 2C)  ->  o_ref: (1, th, Wo, C)
    W-pair reduction is a lane-slice add; H-pair reduction is a major-axis add.
    """
    C = o_ref.shape[3]
    a = x_ref[0, :, 0]                              # rows 2*i
    b = x_ref[0, :, 1]                              # rows 2*i + 1
    s = (a[:, :, :C] + a[:, :, C:]) + (b[:, :, :C] + b[:, :, C:])
    o_ref[0] = (s * 0.25).astype(o_ref.dtype)


# ---------------------------------------------------------------------------
# Wrappers (layout transforms + pallas_call plumbing)
# ---------------------------------------------------------------------------

def _largest_divisor_leq(n, cap):
    cap = max(1, min(n, cap))
    for d in range(cap, 0, -1):
        if n % d == 0:
            return d
    return 1


def conv3x3_s2_p1(x_nchw, weight_oihw, bias, *, x_block_bytes=6 << 20,
                  weight_resident_bytes=12 << 20, min_grid_steps=8):
    """Conv2d(C_in, C_out, kernel=3, stride=2, padding=1), NCHW in/out."""
    B, C, H, W = x_nchw.shape
    C_out = weight_oihw.shape[0]
    Ho = (H - 1) // 2 + 1
    Wo = (W - 1) // 2 + 1
    dt = x_nchw.dtype
    itemsize = jnp.dtype(dt).itemsize

    # --- layout: NCHW -> padded NHWC -> lane-folded parity view (free) ------
    x = jnp.transpose(x_nchw, (0, 2, 3, 1))
    xp = jnp.pad(x, ((0, 0), (1, 2 * Ho + 1 - H), (1, 2 * Wo + 1 - W), (0, 0)))
    # (B, 2Ho+2, 2Wo+2, C) -> (B, Ho+1, 2, Wo+1, 2C): column parity folded into
    # lanes, row parity a major axis.  Pure reshape, no extra HBM pass.
    xr = xp.reshape(B, Ho + 1, 2, Wo + 1, 2 * C)

    # --- weights -------------------------------------------------------------
    # Cast weights to the activation dtype (bf16 activations => bf16 weights).
    w = weight_oihw.astype(dt)
    # wa[ky] (2C, C_out): rows [:C] = W[:,:,ky,0], rows [C:] = W[:,:,ky,1].
    wa = jnp.transpose(jnp.concatenate([w[..., 0], w[..., 1]], axis=1),
                       (2, 1, 0))
    # wb[ky] (Kb, C_out): W[:,:,ky,2].  Zero-pad K to 2C when C is not
    # lane-aligned so the kernel never lane-slices the matmul LHS.
    wb = jnp.transpose(w[..., 2], (2, 1, 0))
    if C % 128 != 0:
        wb = jnp.concatenate([wb, jnp.zeros_like(wb)], axis=1)
    Kb = wb.shape[1]
    b2 = bias.astype(jnp.float32).reshape(1, C_out)

    # --- C_out tiling --------------------------------------------------------
    full_w_bytes = 3 * (2 * C + Kb) * C_out * itemsize
    if full_w_bytes <= weight_resident_bytes:
        tn = C_out                 # weights stay resident for the whole grid
    elif C_out % 256 == 0:
        tn = 256
    elif C_out % 128 == 0:
        tn = 128
    else:
        # Non-128-aligned C_out: keep the full extent (lane-dense rule needs
        # "multiple of 128 or full dim"); partial lane tiles beat a reject.
        tn = C_out
    n_co = C_out // tn

    # --- output-row tiling ---------------------------------------------------
    row_bytes = 2 * (Wo + 1) * 2 * C * itemsize      # bytes per output row
    cap = max(1, x_block_bytes // row_bytes)
    if n_co == 1:
        # Weights are grid-resident, so extra steps only cost ~0.35us each:
        # also split rows far enough to give the DMA pipeline >= ~8 steps.
        cap = min(cap, max(1, Ho // max(1, -(-min_grid_steps // B))))
    th = _largest_divisor_leq(Ho, cap)
    n_h = Ho // th

    # --- grid ordering -------------------------------------------------------
    if n_co == 1:
        grid = (B, n_h, n_co)
        sem = ("parallel", "parallel", "arbitrary")
        unpack = lambda b, t, co: (b, t, co)
    else:
        # co outside the row axis: weights are re-fetched only when co changes.
        grid = (B, n_co, n_h)
        sem = ("parallel", "arbitrary", "arbitrary")
        unpack = lambda b, co, t: (b, t, co)

    def xm_map(*g):
        b, t, co = unpack(*g)
        return (b, t, 0, 0, 0)

    def xh_map(*g):
        b, t, co = unpack(*g)
        return (b, (t + 1) * th, 0, 0, 0)            # 1-row halo (block size 1)

    def wa_map(*g):
        b, t, co = unpack(*g)
        return (0, 0, co)

    def wb_map(*g):
        b, t, co = unpack(*g)
        return (0, 0, co)

    def bias_map(*g):
        b, t, co = unpack(*g)
        return (0, co)

    def out_map(*g):
        b, t, co = unpack(*g)
        return (b, t, 0, co)

    out = pl.pallas_call(
        _conv3x3_s2_kernel,
        out_shape=jax.ShapeDtypeStruct((B, Ho, Wo, C_out), dt),
        grid_spec=pltpu.PrefetchScalarGridSpec(
            num_scalar_prefetch=0,
            grid=grid,
            in_specs=[
                pl.BlockSpec((1, th, 2, Wo + 1, 2 * C), xm_map),
                pl.BlockSpec((1, 1, 2, Wo + 1, 2 * C), xh_map),
                pl.BlockSpec((3, 2 * C, tn), wa_map),
                pl.BlockSpec((3, Kb, tn), wb_map),
                pl.BlockSpec((1, tn), bias_map),
            ],
            out_specs=pl.BlockSpec((1, th, Wo, tn), out_map),
        ),
        compiler_params=pltpu.CompilerParams(
            dimension_semantics=sem,
            vmem_limit_bytes=48 * 1024 * 1024),
    )(xr, xr, wa, wb, b2)

    return jnp.transpose(out, (0, 3, 1, 2))                      # back to NCHW


def avgpool2x2(x_nchw, *, tile_bytes=8 << 20):
    """AvgPool2d(kernel_size=2, stride=2) with PyTorch floor semantics."""
    B, C, H, W = x_nchw.shape
    Ho, Wo = H // 2, W // 2
    x = jnp.transpose(x_nchw, (0, 2, 3, 1))                      # NHWC
    x = x[:, :2 * Ho, :2 * Wo, :]                                # floor for odd H/W
    # Lane-folded parity view: (B, Ho, 2, Wo, 2C), minor dims = (Wo, 2C).
    xr = x.reshape(B, Ho, 2, Wo, 2 * C)

    itemsize = jnp.dtype(x_nchw.dtype).itemsize
    row_bytes = 2 * Wo * 2 * C * itemsize
    th = max(1, min(Ho, tile_bytes // row_bytes))
    n_h = pl.cdiv(Ho, th)                                        # partial last tile OK

    out = pl.pallas_call(
        _avgpool2x2_kernel,
        out_shape=jax.ShapeDtypeStruct((B, Ho, Wo, C), x_nchw.dtype),
        grid_spec=pltpu.PrefetchScalarGridSpec(
            num_scalar_prefetch=0,
            grid=(B, n_h),
            in_specs=[pl.BlockSpec((1, th, 2, Wo, 2 * C),
                                   lambda b, i: (b, i, 0, 0, 0))],
            out_specs=pl.BlockSpec((1, th, Wo, C),
                                   lambda b, i: (b, i, 0, 0)),
        ),
        compiler_params=pltpu.CompilerParams(
            dimension_semantics=("parallel", "parallel"),
            vmem_limit_bytes=48 * 1024 * 1024),
    )(xr)
    return jnp.transpose(out, (0, 3, 1, 2))                      # back to NCHW


# ---------------------------------------------------------------------------
# Module-equivalent wrapper
# ---------------------------------------------------------------------------

class Downsample:
    """JAX/Pallas port of model.op.Downsample (dims=2)."""

    def __init__(self, channels, use_conv, dims=2, out_channels=None,
                 z_down=False, *, key=None):
        self.channels = channels
        self.out_channels = out_channels or channels
        self.use_conv = use_conv
        self.dims = dims
        self.z_down = z_down
        if dims != 2:
            # TODO(synk): dims=1 / dims=3 (with (1,2,2) stride) not implemented.
            raise NotImplementedError("Only dims=2 implemented in Pallas port")
        if use_conv:
            if key is None:
                key = jax.random.PRNGKey(0)
            kw, kb = jax.random.split(key)
            fan_in = channels * 3 * 3
            bound = 1.0 / np.sqrt(fan_in)
            # Deterministic, PyTorch-default-style uniform init.
            self.weight = jax.random.uniform(
                kw, (self.out_channels, channels, 3, 3),
                minval=-bound, maxval=bound, dtype=jnp.float32)
            self.bias = jax.random.uniform(
                kb, (self.out_channels,),
                minval=-bound, maxval=bound, dtype=jnp.float32)
        else:
            assert self.channels == self.out_channels

    def __call__(self, x):
        assert x.shape[1] == self.channels
        if self.use_conv:
            return conv3x3_s2_p1(x, self.weight, self.bias)
        return avgpool2x2(x)


# ---------------------------------------------------------------------------
# Smoke test
# ---------------------------------------------------------------------------

if __name__ == "__main__":
    key = jax.random.PRNGKey(0)
    kx, kp = jax.random.split(key)

    B, C, H, W = 2, 4, 16, 16
    x = jax.random.normal(kx, (B, C, H, W), dtype=jnp.float32)

    # ---- use_conv=True path -------------------------------------------------
    down_conv = Downsample(channels=C, use_conv=True, dims=2, key=kp)
    y_conv = jax.block_until_ready(down_conv(x))

    ref_conv = jax.lax.conv_general_dilated(
        x, down_conv.weight, window_strides=(2, 2),
        padding=((1, 1), (1, 1)),
        dimension_numbers=("NCHW", "OIHW", "NCHW"),
        precision=jax.lax.Precision.HIGHEST,
    ) + down_conv.bias.reshape(1, -1, 1, 1)
    assert y_conv.shape == (B, C, H // 2, W // 2), y_conv.shape
    np.testing.assert_allclose(np.asarray(y_conv), np.asarray(ref_conv),
                               rtol=1e-3, atol=1e-3)

    # ---- use_conv=False path (AvgPool2d(2, 2)) --------------------------------
    down_pool = Downsample(channels=C, use_conv=False, dims=2)
    y_pool = jax.block_until_ready(down_pool(x))
    ref_pool = x.reshape(B, C, H // 2, 2, W // 2, 2).mean(axis=(3, 5))
    assert y_pool.shape == (B, C, H // 2, W // 2), y_pool.shape
    np.testing.assert_allclose(np.asarray(y_pool), np.asarray(ref_pool),
                               rtol=1e-5, atol=1e-5)

    print("KERNEL_OK")
</pallas_src>

<mosaic_0001>
module attributes {stable_mosaic.version = 11 : i64} {
  func.func @_conv3x3_s2_kernel(%arg0: i32, %arg1: i32, %arg2: i32, %arg3: memref<1x2x2x9x8xf32, #tpu.memory_space<vmem>>, %arg4: memref<1x1x2x9x8xf32, #tpu.memory_space<vmem>>, %arg5: memref<3x8x4xf32, #tpu.memory_space<vmem>>, %arg6: memref<3x8x4xf32, #tpu.memory_space<vmem>>, %arg7: memref<1x4xf32, #tpu.memory_space<vmem>>, %arg8: memref<1x2x8x4xf32, #tpu.memory_space<vmem>>) attributes {dimension_semantics = [#tpu.dimension_semantics<parallel>, #tpu.dimension_semantics<parallel>, #tpu.dimension_semantics<arbitrary>], iteration_bounds = array<i64: 2, 4, 1>, scalar_prefetch = 0 : i64, scratch_operands = 0 : i64, tpu.core_type = #tpu.core_type<tc>, window_params = [{transform_indices = @transform_0, window_bounds = array<i64: 1, 2, 2, 9, 8>}, {transform_indices = @transform_1, window_bounds = array<i64: 1, 1, 2, 9, 8>}, {transform_indices = @transform_2, window_bounds = array<i64: 3, 8, 4>}, {transform_indices = @transform_3, window_bounds = array<i64: 3, 8, 4>}, {transform_indices = @transform_4, window_bounds = array<i64: 1, 4>}, {transform_indices = @transform_5, window_bounds = array<i64: 1, 2, 8, 4>}]} {
    %c0 = arith.constant 0 : index
    %c0_0 = arith.constant 0 : index
    %c0_1 = arith.constant 0 : index
    %c0_2 = arith.constant 0 : index
    %c0_3 = arith.constant 0 : index
    %0 = vector.load %arg3[%c0, %c0_0, %c0_1, %c0_2, %c0_3] : memref<1x2x2x9x8xf32, #tpu.memory_space<vmem>>, vector<1x2x2x9x8xf32>
    %1 = vector.shape_cast %0 : vector<1x2x2x9x8xf32> to vector<2x2x9x8xf32>
    %c0_4 = arith.constant 0 : index
    %c0_5 = arith.constant 0 : index
    %c0_6 = arith.constant 0 : index
    %c0_7 = arith.constant 0 : index
    %c0_8 = arith.constant 0 : index
    %2 = vector.load %arg4[%c0_4, %c0_5, %c0_6, %c0_7, %c0_8] : memref<1x1x2x9x8xf32, #tpu.memory_space<vmem>>, vector<1x1x2x9x8xf32>
    %3 = vector.shape_cast %2 : vector<1x1x2x9x8xf32> to vector<1x2x9x8xf32>
    %4 = vector.extract_strided_slice %1 {offsets = [0, 0, 0, 0], sizes = [2, 1, 9, 8], strides = [1, 1, 1, 1]} : vector<2x2x9x8xf32> to vector<2x1x9x8xf32>
    %5 = vector.shape_cast %4 : vector<2x1x9x8xf32> to vector<2x9x8xf32>
    %6 = vector.extract_strided_slice %1 {offsets = [0, 1, 0, 0], sizes = [2, 1, 9, 8], strides = [1, 1, 1, 1]} : vector<2x2x9x8xf32> to vector<2x1x9x8xf32>
    %7 = vector.shape_cast %6 : vector<2x1x9x8xf32> to vector<2x9x8xf32>
    %8 = vector.extract_strided_slice %5 {offsets = [1, 0, 0], sizes = [1, 9, 8], strides = [1, 1, 1]} : vector<2x9x8xf32> to vector<1x9x8xf32>
    %9 = vector.extract_strided_slice %3 {offsets = [0, 0, 0, 0], sizes = [1, 1, 9, 8], strides = [1, 1, 1, 1]} : vector<1x2x9x8xf32> to vector<1x1x9x8xf32>
    %10 = vector.shape_cast %9 : vector<1x1x9x8xf32> to vector<1x9x8xf32>
    %11 = tpu.concatenate %8, %10 in 0 : vector<1x9x8xf32>, vector<1x9x8xf32> -> vector<2x9x8xf32>
    %c0_9 = arith.constant 0 : index
    %c0_10 = arith.constant 0 : index
    %12 = vector.load %arg7[%c0_9, %c0_10] : memref<1x4xf32, #tpu.memory_space<vmem>>, vector<1x4xf32>
    %13 = vector.shape_cast %12 : vector<1x4xf32> to vector<1x4xf32>
    %14 = vector.broadcast %13 : vector<1x4xf32> to vector<16x4xf32>
    %15 = vector.extract_strided_slice %5 {offsets = [0, 0, 0], sizes = [2, 8, 8], strides = [1, 1, 1]} : vector<2x9x8xf32> to vector<2x8x8xf32>
    %16 = vector.shape_cast %15 : vector<2x8x8xf32> to vector<16x8xf32>
    %c0_11 = arith.constant 0 : index
    %c0_12 = arith.constant 0 : index
    %c0_13 = arith.constant 0 : index
    %17 = vector.load %arg5[%c0_11, %c0_12, %c0_13] : memref<3x8x4xf32, #tpu.memory_space<vmem>>, vector<1x8x4xf32>
    %18 = vector.shape_cast %17 : vector<1x8x4xf32> to vector<8x4xf32>
    %cst = arith.constant dense<0.000000e+00> : vector<16x4xf32>
    %19 = tpu.matmul %16, %18, %cst {dimension_numbers = #tpu.dot_dimension_numbers<[1], [0], [0], [1], [0, 0, 1, 1], [], []>} : vector<16x8xf32>, vector<8x4xf32>, vector<16x4xf32> -> vector<16x4xf32>
    %20 = arith.addf %14, %19 : vector<16x4xf32>
    %21 = vector.extract_strided_slice %5 {offsets = [0, 1, 0], sizes = [2, 8, 8], strides = [1, 1, 1]} : vector<2x9x8xf32> to vector<2x8x8xf32>
    %22 = vector.shape_cast %21 : vector<2x8x8xf32> to vector<16x8xf32>
    %c0_14 = arith.constant 0 : index
    %c0_15 = arith.constant 0 : index
    %c0_16 = arith.constant 0 : index
    %23 = vector.load %arg6[%c0_14, %c0_15, %c0_16] : memref<3x8x4xf32, #tpu.memory_space<vmem>>, vector<1x8x4xf32>
    %24 = vector.shape_cast %23 : vector<1x8x4xf32> to vector<8x4xf32>
    %cst_17 = arith.constant dense<0.000000e+00> : vector<16x4xf32>
    %25 = tpu.matmul %22, %24, %cst_17 {dimension_numbers = #tpu.dot_dimension_numbers<[1], [0], [0], [1], [0, 0, 1, 1], [], []>} : vector<16x8xf32>, vector<8x4xf32>, vector<16x4xf32> -> vector<16x4xf32>
    %26 = arith.addf %20, %25 : vector<16x4xf32>
    %27 = vector.extract_strided_slice %7 {offsets = [0, 0, 0], sizes = [2, 8, 8], strides = [1, 1, 1]} : vector<2x9x8xf32> to vector<2x8x8xf32>
    %28 = vector.shape_cast %27 : vector<2x8x8xf32> to vector<16x8xf32>
    %c1 = arith.constant 1 : index
    %c0_18 = arith.constant 0 : index
    %c0_19 = arith.constant 0 : index
    %29 = vector.load %arg5[%c1, %c0_18, %c0_19] : memref<3x8x4xf32, #tpu.memory_space<vmem>>, vector<1x8x4xf32>
    %30 = vector.shape_cast %29 : vector<1x8x4xf32> to vector<8x4xf32>
    %cst_20 = arith.constant dense<0.000000e+00> : vector<16x4xf32>
    %31 = tpu.matmul %28, %30, %cst_20 {dimension_numbers = #tpu.dot_dimension_numbers<[1], [0], [0], [1], [0, 0, 1, 1], [], []>} : vector<16x8xf32>, vector<8x4xf32>, vector<16x4xf32> -> vector<16x4xf32>
    %32 = arith.addf %26, %31 : vector<16x4xf32>
    %33 = vector.extract_strided_slice %7 {offsets = [0, 1, 0], sizes = [2, 8, 8], strides = [1, 1, 1]} : vector<2x9x8xf32> to vector<2x8x8xf32>
    %34 = vector.shape_cast %33 : vector<2x8x8xf32> to vector<16x8xf32>
    %c1_21 = arith.constant 1 : index
    %c0_22 = arith.constant 0 : index
    %c0_23 = arith.constant 0 : index
    %35 = vector.load %arg6[%c1_21, %c0_22, %c0_23] : memref<3x8x4xf32, #tpu.memory_space<vmem>>, vector<1x8x4xf32>
    %36 = vector.shape_cast %35 : vector<1x8x4xf32> to vector<8x4xf32>
    %cst_24 = arith.constant dense<0.000000e+00> : vector<16x4xf32>
    %37 = tpu.matmul %34, %36, %cst_24 {dimension_numbers = #tpu.dot_dimension_numbers<[1], [0], [0], [1], [0, 0, 1, 1], [], []>} : vector<16x8xf32>, vector<8x4xf32>, vector<16x4xf32> -> vector<16x4xf32>
    %38 = arith.addf %32, %37 : vector<16x4xf32>
    %39 = vector.extract_strided_slice %11 {offsets = [0, 0, 0], sizes = [2, 8, 8], strides = [1, 1, 1]} : vector<2x9x8xf32> to vector<2x8x8xf32>
    %40 = vector.shape_cast %39 : vector<2x8x8xf32> to vector<16x8xf32>
    %c2 = arith.constant 2 : index
    %c0_25 = arith.constant 0 : index
    %c0_26 = arith.constant 0 : index
    %41 = vector.load %arg5[%c2, %c0_25, %c0_26] : memref<3x8x4xf32, #tpu.memory_space<vmem>>, vector<1x8x4xf32>
    %42 = vector.shape_cast %41 : vector<1x8x4xf32> to vector<8x4xf32>
    %cst_27 = arith.constant dense<0.000000e+00> : vector<16x4xf32>
    %43 = tpu.matmul %40, %42, %cst_27 {dimension_numbers = #tpu.dot_dimension_numbers<[1], [0], [0], [1], [0, 0, 1, 1], [], []>} : vector<16x8xf32>, vector<8x4xf32>, vector<16x4xf32> -> vector<16x4xf32>
    %44 = arith.addf %38, %43 : vector<16x4xf32>
    %45 = vector.extract_strided_slice %11 {offsets = [0, 1, 0], sizes = [2, 8, 8], strides = [1, 1, 1]} : vector<2x9x8xf32> to vector<2x8x8xf32>
    %46 = vector.shape_cast %45 : vector<2x8x8xf32> to vector<16x8xf32>
    %c2_28 = arith.constant 2 : index
    %c0_29 = arith.constant 0 : index
    %c0_30 = arith.constant 0 : index
    %47 = vector.load %arg6[%c2_28, %c0_29, %c0_30] : memref<3x8x4xf32, #tpu.memory_space<vmem>>, vector<1x8x4xf32>
    %48 = vector.shape_cast %47 : vector<1x8x4xf32> to vector<8x4xf32>
    %cst_31 = arith.constant dense<0.000000e+00> : vector<16x4xf32>
    %49 = tpu.matmul %46, %48, %cst_31 {dimension_numbers = #tpu.dot_dimension_numbers<[1], [0], [0], [1], [0, 0, 1, 1], [], []>} : vector<16x8xf32>, vector<8x4xf32>, vector<16x4xf32> -> vector<16x4xf32>
    %50 = arith.addf %44, %49 : vector<16x4xf32>
    %51 = vector.shape_cast %50 : vector<16x4xf32> to vector<1x2x8x4xf32>
    %c0_32 = arith.constant 0 : index
    %c0_33 = arith.constant 0 : index
    %c0_34 = arith.constant 0 : index
    %c0_35 = arith.constant 0 : index
    %52 = vector.load %arg8[%c0_32, %c0_33, %c0_34, %c0_35] : memref<1x2x8x4xf32, #tpu.memory_space<vmem>>, vector<1x2x8x4xf32>
    tpu.vector_store %arg8[%c0_32, %c0_33, %c0_34, %c0_35], %51 {strides = array<i32>} : memref<1x2x8x4xf32, #tpu.memory_space<vmem>>, vector<1x2x8x4xf32>,
    return
  }
  func.func @transform_0(%arg0: i32, %arg1: i32, %arg2: i32) -> (i32, i32, i32, i32, i32) {
    %c0_i32 = arith.constant 0 : i32
    %c0_i32_0 = arith.constant 0 : i32
    %c0_i32_1 = arith.constant 0 : i32
    %c0_i32_2 = arith.constant 0 : i32
    return %arg0, %arg1, %c0_i32, %c0_i32_0, %c0_i32_1 : i32, i32, i32, i32, i32
  }
  func.func @transform_1(%arg0: i32, %arg1: i32, %arg2: i32) -> (i32, i32, i32, i32, i32) {
    %c1_i32 = arith.constant 1 : i32
    %0 = arith.addi %arg1, %c1_i32 : i32
    %c2_i32 = arith.constant 2 : i32
    %1 = arith.muli %0, %c2_i32 : i32
    %c0_i32 = arith.constant 0 : i32
    %c0_i32_0 = arith.constant 0 : i32
    %c0_i32_1 = arith.constant 0 : i32
    %c0_i32_2 = arith.constant 0 : i32
    return %arg0, %1, %c0_i32, %c0_i32_0, %c0_i32_1 : i32, i32, i32, i32, i32
  }
  func.func @transform_2(%arg0: i32, %arg1: i32, %arg2: i32) -> (i32, i32, i32) {
    %c0_i32 = arith.constant 0 : i32
    %c0_i32_0 = arith.constant 0 : i32
    %c0_i32_1 = arith.constant 0 : i32
    return %c0_i32, %c0_i32_0, %arg2 : i32, i32, i32
  }
  func.func @transform_3(%arg0: i32, %arg1: i32, %arg2: i32) -> (i32, i32, i32) {
    %c0_i32 = arith.constant 0 : i32
    %c0_i32_0 = arith.constant 0 : i32
    %c0_i32_1 = arith.constant 0 : i32
    return %c0_i32, %c0_i32_0, %arg2 : i32, i32, i32
  }
  func.func @transform_4(%arg0: i32, %arg1: i32, %arg2: i32) -> (i32, i32) {
    %c0_i32 = arith.constant 0 : i32
    %c0_i32_0 = arith.constant 0 : i32
    return %c0_i32, %arg2 : i32, i32
  }
  func.func @transform_5(%arg0: i32, %arg1: i32, %arg2: i32) -> (i32, i32, i32, i32) {
    %c0_i32 = arith.constant 0 : i32
    %c0_i32_0 = arith.constant 0 : i32
    return %arg0, %arg1, %c0_i32, %arg2 : i32, i32, i32, i32
  }
}

</mosaic_0001>

<bundles_post_ra>
// kernel: tpu_custom_call.1
= control target key start
LH: loop header
LB: loop body
LE: loop exit
PB: predicated region body
PF: predicated region fallthrough
CT: control target
= control target key end

     0   :  { %s1331_s18 = smov 0   ;;  %s1333_s19 = smov 0   ;;  %s1438_s0 = inlined_call_operand.vmem [shape: f32[2,9,2,9,8], index: 0, kind: input, shape index: {}]   ;;  %s1439_s1 = inlined_call_operand.vmem [shape: f32[2,9,2,9,8], index: 1, kind: input, shape index: {}]   ;;  %s1440_s2 = inlined_call_operand.vmem [shape: f32[3,8,4], index: 2, kind: input, shape index: {}]   ;;  %s1441_s3 = inlined_call_operand.vmem [shape: f32[3,8,4], index: 3, kind: input, shape index: {}]   ;;  %s1442_s4 = inlined_call_operand.vmem [shape: f32[1,4], index: 4, kind: input, shape index: {}]   ;;  %s1443_s5 = inlined_call_operand.vmem [shape: f32[2,8,8,4], index: 5, kind: output, shape index: {}]  }
   0x1   :  { %s1335_s20 = smov 0   ;;  %s1337_s21 = smov 0  }
   0x2   :  { %s1339_s22 = smov 0  }
   0x3 LB: > { %s30_s23 = sadd.s32 1, %s1291_s20  ;;  %s34_s24 = sadd.s32 1, %s1295_s21  ;;  %s1299_s22 = sphi %s1339_s22, %s15_s22   ;;  %s1295_s21 = sphi %s1337_s21, %s1447_s21   ;;  %s1291_s20 = sphi %s1335_s20, %s1446_s20   ;;  %s1287_s19 = sphi %s1333_s19, %s1445_s19   ;;  %s1283_s18 = sphi %s1331_s18, %s1444_s18  }
   0x4   : > { %p32_p0 = scmp.ge.s32.totalorder %s30_s23, 4  ;;  %p1125_p1 = scmp.ge.s32.totalorder %s1299_s22, 1 }
   0x5   : > { %p280_p2 = scmp.lt.s32.totalorder %s1299_s22, 9 }
   0x6   : > { %s1449_s23 = smov (%p32_p0, %s30_s23), 0  ;;  %s1451_s24 = smov (!%p32_p0, %s34_s24), %s1295_s21 }
   0x7   : > { %p281_p3 = pnand %p1125_p1, %p280_p2  ;;  %p36_p4 = scmp.ge.s32.totalorder %s1451_s24, 2 }
   0x8   : > { %v425_v0 = vld [vmem:[%s1440_s2] sm:$0xff] (!%p281_p3)  ;;  %s1364_s27 = sshll.u32 (!%p281_p3), %s1283_s18, 1  ;;  %p355_p5 = scmp.lt.s32.totalorder (!%p281_p3), %s1287_s19, 1  ;;  %v1143_v2 = vld [vmem:[%s1441_s3 + $0x8] sm:$0xff] (!%p281_p3)  ;;  %v1146_v3 = vld [vmem:[%s1440_s2 + $0x10] sm:$0xff] (!%p281_p3)  ;;  %vm426_vm0 = vcmask (!%p281_p3), 64512  }
   0x9   : > { %s1453_s24 = smov (%p36_p4, %s1451_s24), 0  ;;  %284 = sbr.rel (%p281_p3) target bundleno = 261 (0x105), region = 40 }
   0xa   : > { %v519_v1 = vld [vmem:[%s1441_s3] sm:$0xff] (!%p281_p3)  ;;  %1178 = vmatprep.subr.mxu1 (!%p281_p3), %v425_v0  ;;  %p357_p6 = scmp.lt.s32.totalorder (!%p281_p3), %s1364_s27, 8  ;;  %1193 = vmatprep.subr.mxu0 (!%p281_p3), %v1143_v2  ;;  %s1159_s9 = sadd.s32 (!%p281_p3), 2, %s1364_s27  ;;  %vm512_vm1 = vcmask (!%p281_p3), 1046528   ;;  %v1140_v11 = vld [vmem:[%s1440_s2 + $0x8] sm:$0xff] (!%p281_p3)  ;;  %v1149_v24 = vld [vmem:[%s1441_s3 + $0x10] sm:$0xff] (!%p281_p3) }
   0xb   : > { %1179 = vmatpush3.msra.mxu1 (!%p281_p3), %v425_v0  ;;  %1194 = vmatpush3.msra.mxu0 (!%p281_p3), %v1143_v2  ;;  %p375_p7 = scmp.lt.s32.totalorder (!%p281_p3), %s1159_s9, 8  ;;  %p398_p8 = scmp.lt.s32.totalorder (!%p281_p3), %s1364_s27, 7  ;;  %v1135_v31 = vld [vmem:[%s1442_s4] ss:$0 sm:$0xff] (!%p281_p3)  ;;  %vm944_vm2 = vcmask (!%p281_p3), 31744  }
   0xc   : > { %1183 = vmatprep.subr.mxu1 (!%p281_p3), %v519_v1  ;;  %1198 = vmatprep.subr.mxu0 (!%p281_p3), %v1146_v3 }
  0x10   : > { %s1455_s19 = smov (!%p355_p5, %s1287_s19), 1  ;;  %s1457_s9 = smov (!%p375_p7, %s1159_s9), 8 }
  0x11   : > { %s358_s10 = scalar_select %p357_p6, %s1364_s27, 8 }
  0x12   : > { %s1220_s11 = smul.u32 36, %s1455_s19  ;;  %s1130_s26 = sshll.u32 %s1457_s9, 2 }
  0x13   : > { %s1127_s12 = sshll.u32 %s358_s10, 2  ;;  %s1459_s27 = smov (!%p398_p8, %s1364_s27), 7 }
  0x14   : > { %s361_s13 = sadd.s32 %s1220_s11, %s1127_s12  ;;  %s379_s28 = sadd.s32 %s1220_s11, %s1130_s26 }
  0x15   : > { %s1128_s14 = sshll.u32 %s361_s13, 3  ;;  %s1131_s6 = sshll.u32 %s379_s28, 3 }
  0x16   : > { %s363_s17 = scalar_lea.vmem %s1438_s0, %s1128_s14  ;;  %s381_s9 = scalar_lea.vmem %s1439_s1, %s1131_s6 }
  0x17   : > { %v408_v4 = vld [vmem:[%s363_s17] sm:$0xff]  ;;  %v410_v6 = vld [vmem:[%s363_s17 + $0x10] sm:$0xff]  ;;  %v411_v8 = vld [vmem:[%s363_s17 + $0x18] sm:$0x1]  ;;  %s1133_s10 = sshll.u32 %s1455_s19, 3 }
  0x18   : > { %v412_v5 = vld [vmem:[%s363_s17 + $0x20] sm:$0xff]  ;;  %1180 = vmatprep.mubr.msk.f32.mxu1 %vm426_vm0, %v408_v4  ;;  %v513_v7 = vrot.slane %v408_v4, 1  ;;  %v688_v9 = vrot.slane %v410_v6, 1  ;;  %v414_v10 = vld [vmem:[%s363_s17 + $0x30] sm:$0xff]  ;;  %v689_v12 = vrot.slane %v411_v8, 1  ;;  %s404_s13 = sadd.s32 %s1133_s10, %s1459_s27 }
  0x19   : > { %1181 = vmatmul.mubr.msk.f32.vlgmr.msra.gmra.mrb[0].mxu1 %vm426_vm0, %v412_v5  ;;  %v415_v13 = vld [vmem:[%s363_s17 + $0x38] sm:$0x1]  ;;  %v691_v14 = vrot.slane %v414_v10, 1  ;;  %v409_v15 = vld [vmem:[%s363_s17 + $0x8] sm:$0x1]  ;;  %v516_v16 = vrot.slane %v412_v5, 1 }
  0x1a   : > { %1184 = vmatpush3.msra.mxu1 %v519_v1  ;;  %v692_v17 = vrot.slane %v415_v13, 1  ;;  %v514_v18 = vrot.slane %v409_v15, 1  ;;  %v413_v19 = vld [vmem:[%s363_s17 + $0x28] sm:$0x1]  ;;  %v690_v20 = vsel %vm512_vm1, %v688_v9, %v689_v12  ;;  %v416_v26 = vld [vmem:[%s381_s9] sm:$0xff]  ;;  %s1134_s14 = sshll.u32 %s404_s13, 3 }
  0x1b   : > { %v517_v21 = vrot.slane %v413_v19, 1  ;;  %1188 = vmatprep.subr.mxu1 %v1140_v11  ;;  %1195 = vmatprep.mubr.msk.f32.mxu0 %vm426_vm0, %v690_v20  ;;  %v417_v27 = vld [vmem:[%s381_s9 + $0x8] sm:$0x1]  ;;  %v860_v28 = vrot.slane %v416_v26, 1  ;;  %s406_s17 = scalar_lea.vmem %s1443_s5, %s1134_s14 }
  0x1c   : > { %v693_v22 = vsel %vm512_vm1, %v691_v14, %v692_v17  ;;  %v515_v23 = vsel %vm512_vm1, %v513_v7, %v514_v18  ;;  %v861_v29 = vrot.slane %v417_v27, 1 }
  0x1d   : > { %1196 = vmatmul.mubr.msk.f32.vlgmr.msra.gmra.mrb[0].mxu0 %vm426_vm0, %v693_v22  ;;  %1185 = vmatprep.mubr.msk.f32.mxu1 %vm426_vm0, %v515_v23  ;;  %v518_v25 = vsel %vm512_vm1, %v516_v16, %v517_v21 }
  0x1e   : > { %1199 = vmatpush3.msra.mxu0 %v1146_v3  ;;  %1200 = vmatprep.mubr.msk.f32.mxu0 %vm426_vm0, %v412_v5  ;;  %v862_v30 = vsel %vm512_vm1, %v860_v28, %v861_v29 }
  0x1f   : > { %1203 = vmatprep.subr.mxu0 %v1149_v24 }
  0x21   : > { %1186 = vmatmul.mubr.msk.f32.vlgmr.msra.gmra.mrb[0].mxu1 %vm426_vm0, %v518_v25 }
  0x22   : > { %1189 = vmatpush3.msra.mxu1 %v1140_v11  ;;  %1190 = vmatprep.mubr.msk.f32.mxu1 %vm426_vm0, %v410_v6 }
  0x25   : > { %1201 = vmatmul.mubr.msk.f32.vlgmr.msra.gmra.mrb[0].mxu0 %vm426_vm0, %v416_v26 }
  0x26   : > { %1204 = vmatpush3.msra.mxu0 %v1149_v24  ;;  %1205 = vmatprep.mubr.msk.f32.mxu0 %vm426_vm0, %v518_v25 }
  0x29   : > { %1191 = vmatmul.mubr.msk.f32.vlgmr.msra.gmra.mrb[0].mxu1 %vm426_vm0, %v414_v10 }
  0x2d   : > { %1206 = vmatmul.mubr.msk.f32.vlgmr.msra.gmra.mrb[0].mxu0 %vm426_vm0, %v862_v30 }
  0xfc   : > { %v1192_v32 = vpop.f32.mrb[0].mxu1 }
  0xfd   : > { %v1208_v33 = vadd.f32 %v1192_v32, %v1135_v31  ;;  %v675_v34 = vpop.f32.mrb[1].mxu1 }
  0xfe   : > { %v1210_v35 = vadd.f32 %v1135_v31, %v675_v34 }
 0x100   : > { %v1207_v36 = vpop.f32.mrb[0].mxu0 }
 0x101   : > { %v1209_v37 = vadd.f32 %v1208_v33, %v1207_v36  ;;  %v933_v38 = vpop.f32.mrb[1].mxu0 }
 0x102   : > { %v1211_v39 = vadd.f32 %v1210_v35, %v933_v38 }
 0x103   : > { %946 = vst.msk [vmem:[%s406_s17 + $0x8] sm:$0xff] %vm944_vm2, %v1209_v37 }
 0x104   : > { %945 = vst.msk [vmem:[%s406_s17] sm:$0xff] %vm944_vm2, %v1211_v39 }
 0x105 PF: > { %s15_s22 = sadd.s32 1, %s1299_s22   ;;  %s1444_s18 = smov %s1291_s20 }
 0x106   : > { %p12_p9 = scmp.ge.s32.totalorder %s15_s22, 10   ;;  %s1445_s19 = smov %s1295_s21 }
 0x107   : > { %s1446_s20 = smov %s1449_s23  ;;  %s1447_s21 = smov %s1453_s24 }
 0x108   :  { %14 = sbr.rel (!%p12_p9) target bundleno = 3 (0x3), region = 86 }

</bundles_post_ra>
